<compile_context>
chip_gen: v7x
topology: tpu7x:2x2x1
jax: 0.10.0
libtpu: 0.0.40
codegen_flags: <defaults>
</compile_context>

<pallas_src>
import functools
import math

import numpy as np
import jax
import jax.numpy as jnp
from jax.experimental import pallas as pl
from jax.experimental.pallas import tpu as pltpu

PATCH_SIZE = 14          # DINOv2 patch size (model.patch_size)
EMBED_DIM = 128          # synthetic (small, lane-aligned) embedding dim
NUM_HEADS = 4            # synthetic (small) number of heads
TEMPERATURE = 10.0       # DiNORandomResizedCrop default -> DensityGenerator
CONV_KERNEL_SIZE = 5     # DiNORandomResizedCrop default -> DensityGenerator


# ---------------------------------------------------------------------------
# Fused Pallas kernel: patch embedding + head-mean CLS attention + Density.
# ---------------------------------------------------------------------------
def _attn_density_kernel(patches_ref, we_t_ref, eb_ref, u_ref, c0_ref,
                         masks_ref, out_ref, *, wf, ksize, inv_temp):
    L = out_ref.shape[-1]

    # Synthetic backbone patch embedding, fused in-kernel: bf16 MXU inputs,
    # f32 accumulation, f32 bias add (removes the separate XLA matmul launch
    # and the feats HBM round trip).
    feats = jnp.dot(patches_ref[...], we_t_ref[...],
                    preferred_element_type=jnp.float32) + eb_ref[...]     # (L, C)

    # Head-mean pre-softmax CLS attention: the Q path and Wk are folded
    # offline into the constant vector u (replicated to 8 sublanes for a
    # well-formed MXU lhs), so attention collapses to one lane-dense NT
    # matvec; the q·bk constant is added back from a precomputed lane vector
    # (NOT softmax-invariant because of the boundary-masked box filter).
    attn8 = jax.lax.dot_general(u_ref[...], feats.astype(jnp.bfloat16),
                                (((1,), (1,)), ((), ())),
                                preferred_element_type=jnp.float32)       # (8, L)
    attn = attn8[0:1, :] + c0_ref[...]                                    # (1, L)

    # Separable 5x5 ones 'same' (zero-padded) conv on the flattened (hf, wf)
    # map: XLU lane rolls; every boundary mask is a trace-time constant row of
    # masks_ref, so each tap is roll + one FMA.
    p = ksize // 2
    taps = [dd for dd in range(-p, p + 1) if dd != 0]
    nt = len(taps)

    acc_w = attn                                    # width pass (within rows)
    for i, dd in enumerate(taps):
        shifted = pltpu.roll(attn, shift=(-dd) % L, axis=1)
        acc_w = acc_w + masks_ref[i:i + 1, :] * shifted

    conv = acc_w                                    # height pass (across rows)
    for i, dd in enumerate(taps):
        off = dd * wf
        shifted = pltpu.roll(acc_w, shift=(-off) % L, axis=1)
        conv = conv + masks_ref[nt + i:nt + i + 1, :] * shifted

    # softmax(conv / temperature) over the Np valid lanes.  The reference's
    # min-subtraction is a uniform shift, exactly cancelled by the softmax
    # max-subtraction, so it is skipped as dead work.
    valid = masks_ref[2 * nt:2 * nt + 1, :]
    z = jnp.where(valid != 0.0, conv * inv_temp, -1e30)
    z = z - jnp.max(z, axis=1, keepdims=True)
    e = jnp.exp(z)
    denom = jnp.sum(e, axis=1, keepdims=True)
    out_ref[...] = e * pl.reciprocal(denom, approx=True)


def fused_attention_density(patches_pad, we_t, embed_b, u8, c0_row, masks,
                            *, wf, ksize, temperature):
    L, Dp = patches_pad.shape
    C = we_t.shape[1]
    kernel = functools.partial(_attn_density_kernel, wf=wf, ksize=ksize,
                               inv_temp=1.0 / temperature)
    # NOTE: with grid=(1,) and the q/Wk fold the residual input DMA is only
    # ~320 KiB, so single-buffering (pl.Buffered(1)) is moot.
    # TODO(synk): at realistic DINOv2 sizes (Np~1369, C=768) split L over a
    # leading "parallel" grid axis (multiple-of-256 row tiles) so both v7x
    # TensorCores work, and budget block sizes against v7x's 64 MiB VMEM;
    # keep the separable roll conv (never a dense (Np,Np) conv matrix).
    return pl.pallas_call(
        kernel,
        out_shape=jax.ShapeDtypeStruct((1, L), jnp.float32),
        grid=(1,),
        in_specs=[
            pl.BlockSpec((L, Dp), lambda i: (0, 0)),
            pl.BlockSpec((Dp, C), lambda i: (0, 0)),
            pl.BlockSpec((1, C), lambda i: (0, 0)),
            pl.BlockSpec((8, C), lambda i: (0, 0)),
            pl.BlockSpec((1, L), lambda i: (0, 0)),
            pl.BlockSpec((masks.shape[0], L), lambda i: (0, 0)),
        ],
        out_specs=pl.BlockSpec((1, L), lambda i: (0, 0)),
        compiler_params=pltpu.CompilerParams(dimension_semantics=("arbitrary",)),
    )(patches_pad, we_t, embed_b, u8, c0_row, masks)


# ---------------------------------------------------------------------------
# Whole density path (patchify -> fused kernel -> bicubic resize) in ONE jit.
# ---------------------------------------------------------------------------
@functools.partial(jax.jit, static_argnames=("hf", "wf", "d_patch", "ksize",
                                             "temperature", "out_h", "out_w"))
def compute_density(img, we_t, embed_b, u, c0, *, hf, wf, d_patch, ksize,
                    temperature, out_h, out_w):
    Np = hf * wf
    L = ((Np + 127) // 128) * 128            # lane-dense padded token count
    Dp = we_t.shape[0]

    # Patchify + pad + bf16 cast feeding the fused kernel's embedding matmul.
    patches = img.reshape(3, hf, PATCH_SIZE, wf, PATCH_SIZE)
    patches = patches.transpose(1, 3, 0, 2, 4).reshape(Np, d_patch)
    patches_pad = jnp.pad(
        patches, ((0, L - Np), (0, Dp - d_patch))).astype(jnp.bfloat16)

    # Trace-time constant boundary / validity masks for the separable conv.
    p = ksize // 2
    pos = np.arange(L)
    col = pos % wf
    taps = [dd for dd in range(-p, p + 1) if dd != 0]
    rows = []
    for dd in taps:                          # width pass (within-row taps)
        rows.append(((col + dd >= 0) & (col + dd < wf) &
                     (pos + dd >= 0) & (pos + dd < Np)).astype(np.float32))
    for dd in taps:                          # height pass (across-row taps)
        off = dd * wf
        rows.append(((pos + off >= 0) & (pos + off < Np)).astype(np.float32))
    rows.append((pos < Np).astype(np.float32))     # softmax validity
    n_rows = ((len(rows) + 7) // 8) * 8
    masks = np.zeros((n_rows, L), np.float32)
    masks[:len(rows)] = np.stack(rows)

    u8 = jnp.broadcast_to(u, (8, u.shape[1])).astype(jnp.bfloat16)
    c0_row = jnp.full((1, L), c0, jnp.float32)

    density_flat = fused_attention_density(
        patches_pad, we_t, embed_b, u8, c0_row, jnp.asarray(masks),
        wf=wf, ksize=ksize, temperature=temperature)
    density = density_flat[0, :Np].reshape(hf, wf)

    # TODO(synk): torchvision's antialiased bicubic resize is approximated
    # with jax.image.resize(method='bicubic') (no antialias filter).
    return jax.image.resize(density, (out_h, out_w), method='bicubic')


# ---------------------------------------------------------------------------
# Glue (parameter setup, sampling, crop) in plain JAX / Python
# ---------------------------------------------------------------------------
def init_params(key, in_ch=3, patch=PATCH_SIZE, embed=EMBED_DIM,
                num_heads=NUM_HEADS):
    ks = jax.random.split(key, 5)
    d_patch = in_ch * patch * patch
    d_pad = ((d_patch + 127) // 128) * 128
    embed_w = 0.02 * jax.random.normal(ks[0], (embed, d_patch), jnp.float32)
    embed_b = 0.02 * jax.random.normal(ks[1], (embed,), jnp.float32)
    cls_token = 0.02 * jax.random.normal(ks[2], (1, embed), jnp.float32)
    qkv_w = 0.02 * jax.random.normal(ks[3], (3 * embed, embed), jnp.float32)
    qkv_b = 0.02 * jax.random.normal(ks[4], (3 * embed,), jnp.float32)
    head_dim = embed // num_heads
    fold = (head_dim ** -0.5) / num_heads     # attn scale and 1/nh head-mean
    wq, bq = qkv_w[:embed], qkv_b[:embed]
    wk, bk = qkv_w[embed:2 * embed], qkv_b[embed:2 * embed]
    # Head-mean PRE-softmax CLS attention (exactly what get_self_attention
    # returns) is linear in the K projection, so the whole Q path and Wk fold
    # offline into one (1, C) vector u plus the scalar q·bk.
    q_vec = (cls_token @ wq.T + bq) * fold             # (1, C)
    u = q_vec @ wk                                     # (1, C)
    c0 = jnp.sum(q_vec * bk)                           # scalar q·bk
    we_t = jnp.zeros((d_pad, embed), jnp.float32).at[:d_patch].set(embed_w.T)
    return dict(we_t_bf16=we_t.astype(jnp.bfloat16),
                embed_b=embed_b.reshape(1, embed),
                u=u, c0=c0, d_patch=d_patch)


def generate_point(density, target_size, key):
    Hd, Wd = density.shape
    h, w = target_size
    d = density.reshape(-1)
    d = d / jnp.sum(d)
    cum = jnp.cumsum(d)
    us = jax.random.uniform(key, (11,))
    # One vectorized searchsorted + one device->host sync for all candidates.
    idxs = np.asarray(jnp.searchsorted(cum, us))
    for t in range(10):
        idx = int(idxs[t])
        x, y = idx % Wd, idx // Wd
        if (y - h // 2 >= 0 and y + h // 2 < Hd and
                x - w // 2 >= 0 and x + w // 2 < Wd):
            return x, y
    return Wd // 2, Hd // 2


def crop_with_zero_pad(img, top, left, h, w):
    # torchvision F.crop semantics: out-of-bounds regions are zero-padded
    C, H, W = img.shape
    out = jnp.zeros((C, h, w), img.dtype)
    t0, l0 = max(top, 0), max(left, 0)
    t1, l1 = min(top + h, H), min(left + w, W)
    if t1 > t0 and l1 > l0:
        out = out.at[:, t0 - top:t1 - top, l0 - left:l1 - left].set(
            img[:, t0:t1, l0:l1])
    return out


def dino_random_resized_crop(img, params, key, *, size=(16, 16),
                             scale=(0.08, 1.0), ratio=(3.0 / 4.0, 4.0 / 3.0)):
    C, H, W = img.shape
    assert C == 3 and H % PATCH_SIZE == 0 and W % PATCH_SIZE == 0
    hf, wf = H // PATCH_SIZE, W // PATCH_SIZE

    # --- backbone + CLS attention + DensityGenerator (one jit, one kernel) --
    # TODO(synk): the pretrained DINOv2 backbone (torch.hub /
    # get_intermediate_layers) has no in-script equivalent; it is replaced by
    # a deterministic synthetic patch-embedding feeding the same qkv math.
    density = compute_density(
        img, params['we_t_bf16'], params['embed_b'], params['u'], params['c0'],
        hf=hf, wf=wf, d_patch=params['d_patch'], ksize=CONV_KERNEL_SIZE,
        temperature=TEMPERATURE, out_h=H, out_w=W)

    # --- get_params: sample crop window from the density --------------------
    # TODO(synk): data-dependent crop shapes require host round-trips and
    # per-shape resize recompiles (inherent to torchvision's dynamic crops);
    # syncs are batched to 3 device->host transfers total.
    area = float(H * W)
    log_ratio = (math.log(ratio[0]), math.log(ratio[1]))
    k_ta, k_ar, k_pt = jax.random.split(key, 3)
    ta_fracs = np.asarray(jax.random.uniform(
        k_ta, (10,), minval=scale[0], maxval=scale[1]))
    aspects = np.asarray(jnp.exp(jax.random.uniform(
        k_ar, (10,), minval=log_ratio[0], maxval=log_ratio[1])))
    crop = None
    for t in range(10):
        target_area = area * float(ta_fracs[t])
        aspect = float(aspects[t])
        w = int(round(math.sqrt(target_area * aspect)))
        h = int(round(math.sqrt(target_area / aspect)))
        if 0 < w <= W and 0 < h <= H:
            x, y = generate_point(density, (h, w), k_pt)
            crop = (y - h // 2, x - w // 2, h, w)
            break
    if crop is None:  # fallback to central crop
        in_ratio = float(W) / float(H)
        if in_ratio < min(ratio):
            w = W; h = int(round(w / min(ratio)))
        elif in_ratio > max(ratio):
            h = H; w = int(round(h * max(ratio)))
        else:
            w, h = W, H
        crop = ((H - h) // 2, (W - w) // 2, h, w)
    i, j, h, w = crop

    # --- F.resized_crop (bilinear) ------------------------------------------
    cropped = crop_with_zero_pad(img, i, j, h, w)
    return jax.image.resize(cropped, (3, size[0], size[1]), method='bilinear')


if __name__ == "__main__":
    key = jax.random.PRNGKey(0)
    k_img, k_param, k_sample = jax.random.split(key, 3)
    H = W = 56                     # small spatial size, divisible by patch size 14
    img = jax.random.normal(k_img, (3, H, W), jnp.float32)
    params = init_params(k_param)

    out = dino_random_resized_crop(img, params, k_sample, size=(16, 16))
    out = jax.block_until_ready(out)
    assert out.shape == (3, 16, 16) and out.dtype == jnp.float32
    print("KERNEL_OK")
</pallas_src>

<mosaic_0001>
module attributes {stable_mosaic.version = 11 : i64} {
  func.func @_attn_density_kernel(%arg0: i32, %arg1: memref<128x640xbf16, #tpu.memory_space<vmem>>, %arg2: memref<640x128xbf16, #tpu.memory_space<vmem>>, %arg3: memref<1x128xf32, #tpu.memory_space<vmem>>, %arg4: memref<8x128xbf16, #tpu.memory_space<vmem>>, %arg5: memref<1x128xf32, #tpu.memory_space<vmem>>, %arg6: memref<16x128xf32, #tpu.memory_space<vmem>>, %arg7: memref<1x128xf32, #tpu.memory_space<vmem>>) attributes {dimension_semantics = [#tpu.dimension_semantics<arbitrary>], iteration_bounds = array<i64: 1>, scalar_prefetch = 0 : i64, scratch_operands = 0 : i64, tpu.core_type = #tpu.core_type<tc>, window_params = [{pipeline_mode = #tpu.pipeline_mode<synchronous>, transform_indices = @transform_0, window_bounds = array<i64: 128, 640>}, {pipeline_mode = #tpu.pipeline_mode<synchronous>, transform_indices = @transform_1, window_bounds = array<i64: 640, 128>}, {pipeline_mode = #tpu.pipeline_mode<synchronous>, transform_indices = @transform_2, window_bounds = array<i64: 1, 128>}, {pipeline_mode = #tpu.pipeline_mode<synchronous>, transform_indices = @transform_3, window_bounds = array<i64: 8, 128>}, {pipeline_mode = #tpu.pipeline_mode<synchronous>, transform_indices = @transform_4, window_bounds = array<i64: 1, 128>}, {pipeline_mode = #tpu.pipeline_mode<synchronous>, transform_indices = @transform_5, window_bounds = array<i64: 16, 128>}, {pipeline_mode = #tpu.pipeline_mode<synchronous>, transform_indices = @transform_6, window_bounds = array<i64: 1, 128>}]} {
    %c0 = arith.constant 0 : index
    %c0_0 = arith.constant 0 : index
    %0 = vector.load %arg1[%c0, %c0_0] : memref<128x640xbf16, #tpu.memory_space<vmem>>, vector<128x640xbf16>
    %c0_1 = arith.constant 0 : index
    %c0_2 = arith.constant 0 : index
    %1 = vector.load %arg2[%c0_1, %c0_2] : memref<640x128xbf16, #tpu.memory_space<vmem>>, vector<640x128xbf16>
    %cst = arith.constant dense<0.000000e+00> : vector<128x128xf32>
    %2 = tpu.matmul %0, %1, %cst {dimension_numbers = #tpu.dot_dimension_numbers<[1], [0], [0], [1], [0, 0, 1, 1], [], []>} : vector<128x640xbf16>, vector<640x128xbf16>, vector<128x128xf32> -> vector<128x128xf32>
    %c0_3 = arith.constant 0 : index
    %c0_4 = arith.constant 0 : index
    %3 = vector.load %arg3[%c0_3, %c0_4] : memref<1x128xf32, #tpu.memory_space<vmem>>, vector<1x128xf32>
    %4 = vector.broadcast %3 : vector<1x128xf32> to vector<128x128xf32>
    %5 = arith.addf %2, %4 : vector<128x128xf32>
    %c0_5 = arith.constant 0 : index
    %c0_6 = arith.constant 0 : index
    %6 = vector.load %arg4[%c0_5, %c0_6] : memref<8x128xbf16, #tpu.memory_space<vmem>>, vector<8x128xbf16>
    %7 = arith.truncf %5 : vector<128x128xf32> to vector<128x128xbf16>
    %cst_7 = arith.constant dense<0.000000e+00> : vector<8x128xf32>
    %8 = tpu.matmul %6, %7, %cst_7 {dimension_numbers = #tpu.dot_dimension_numbers<[1], [1], [0], [0], [0, 0, 1, 0], [], []>} : vector<8x128xbf16>, vector<128x128xbf16>, vector<8x128xf32> -> vector<8x128xf32>
    %9 = vector.extract_strided_slice %8 {offsets = [0, 0], sizes = [1, 128], strides = [1, 1]} : vector<8x128xf32> to vector<1x128xf32>
    %c0_8 = arith.constant 0 : index
    %c0_9 = arith.constant 0 : index
    %10 = vector.load %arg5[%c0_8, %c0_9] : memref<1x128xf32, #tpu.memory_space<vmem>>, vector<1x128xf32>
    %11 = arith.addf %9, %10 : vector<1x128xf32>
    %c2_i32 = arith.constant 2 : i32
    %12 = tpu.dynamic_rotate %11 by %c2_i32 dim 1 : vector<1x128xf32>, i32 -> vector<1x128xf32>
    %c0_10 = arith.constant 0 : index
    %c0_11 = arith.constant 0 : index
    %13 = vector.load %arg6[%c0_10, %c0_11] : memref<16x128xf32, #tpu.memory_space<vmem>>, vector<1x128xf32>
    %14 = arith.mulf %13, %12 : vector<1x128xf32>
    %15 = arith.addf %11, %14 : vector<1x128xf32>
    %c1_i32 = arith.constant 1 : i32
    %16 = tpu.dynamic_rotate %11 by %c1_i32 dim 1 : vector<1x128xf32>, i32 -> vector<1x128xf32>
    %c1 = arith.constant 1 : index
    %c0_12 = arith.constant 0 : index
    %17 = vector.load %arg6[%c1, %c0_12] : memref<16x128xf32, #tpu.memory_space<vmem>>, vector<1x128xf32>
    %18 = arith.mulf %17, %16 : vector<1x128xf32>
    %19 = arith.addf %15, %18 : vector<1x128xf32>
    %c127_i32 = arith.constant 127 : i32
    %20 = tpu.dynamic_rotate %11 by %c127_i32 dim 1 : vector<1x128xf32>, i32 -> vector<1x128xf32>
    %c2 = arith.constant 2 : index
    %c0_13 = arith.constant 0 : index
    %21 = vector.load %arg6[%c2, %c0_13] : memref<16x128xf32, #tpu.memory_space<vmem>>, vector<1x128xf32>
    %22 = arith.mulf %21, %20 : vector<1x128xf32>
    %23 = arith.addf %19, %22 : vector<1x128xf32>
    %c126_i32 = arith.constant 126 : i32
    %24 = tpu.dynamic_rotate %11 by %c126_i32 dim 1 : vector<1x128xf32>, i32 -> vector<1x128xf32>
    %c3 = arith.constant 3 : index
    %c0_14 = arith.constant 0 : index
    %25 = vector.load %arg6[%c3, %c0_14] : memref<16x128xf32, #tpu.memory_space<vmem>>, vector<1x128xf32>
    %26 = arith.mulf %25, %24 : vector<1x128xf32>
    %27 = arith.addf %23, %26 : vector<1x128xf32>
    %c8_i32 = arith.constant 8 : i32
    %28 = tpu.dynamic_rotate %27 by %c8_i32 dim 1 : vector<1x128xf32>, i32 -> vector<1x128xf32>
    %c4 = arith.constant 4 : index
    %c0_15 = arith.constant 0 : index
    %29 = vector.load %arg6[%c4, %c0_15] : memref<16x128xf32, #tpu.memory_space<vmem>>, vector<1x128xf32>
    %30 = arith.mulf %29, %28 : vector<1x128xf32>
    %31 = arith.addf %27, %30 : vector<1x128xf32>
    %c4_i32 = arith.constant 4 : i32
    %32 = tpu.dynamic_rotate %27 by %c4_i32 dim 1 : vector<1x128xf32>, i32 -> vector<1x128xf32>
    %c5 = arith.constant 5 : index
    %c0_16 = arith.constant 0 : index
    %33 = vector.load %arg6[%c5, %c0_16] : memref<16x128xf32, #tpu.memory_space<vmem>>, vector<1x128xf32>
    %34 = arith.mulf %33, %32 : vector<1x128xf32>
    %35 = arith.addf %31, %34 : vector<1x128xf32>
    %c124_i32 = arith.constant 124 : i32
    %36 = tpu.dynamic_rotate %27 by %c124_i32 dim 1 : vector<1x128xf32>, i32 -> vector<1x128xf32>
    %c6 = arith.constant 6 : index
    %c0_17 = arith.constant 0 : index
    %37 = vector.load %arg6[%c6, %c0_17] : memref<16x128xf32, #tpu.memory_space<vmem>>, vector<1x128xf32>
    %38 = arith.mulf %37, %36 : vector<1x128xf32>
    %39 = arith.addf %35, %38 : vector<1x128xf32>
    %c120_i32 = arith.constant 120 : i32
    %40 = tpu.dynamic_rotate %27 by %c120_i32 dim 1 : vector<1x128xf32>, i32 -> vector<1x128xf32>
    %c7 = arith.constant 7 : index
    %c0_18 = arith.constant 0 : index
    %41 = vector.load %arg6[%c7, %c0_18] : memref<16x128xf32, #tpu.memory_space<vmem>>, vector<1x128xf32>
    %42 = arith.mulf %41, %40 : vector<1x128xf32>
    %43 = arith.addf %39, %42 : vector<1x128xf32>
    %c8 = arith.constant 8 : index
    %c0_19 = arith.constant 0 : index
    %44 = vector.load %arg6[%c8, %c0_19] : memref<16x128xf32, #tpu.memory_space<vmem>>, vector<1x128xf32>
    %cst_20 = arith.constant 0.000000e+00 : f32
    %45 = vector.broadcast %cst_20 : f32 to vector<1x128xf32>
    %46 = arith.cmpf one, %44, %45 : vector<1x128xf32>
    %cst_21 = arith.constant 1.000000e-01 : f32
    %47 = vector.broadcast %cst_21 : f32 to vector<1x128xf32>
    %48 = arith.mulf %43, %47 : vector<1x128xf32>
    %cst_22 = arith.constant -1.000000e+30 : f32
    %49 = vector.broadcast %cst_22 : f32 to vector<1x128xf32>
    %50 = arith.select %46, %48, %49 : vector<1x128xi1>, vector<1x128xf32>
    %cst_23 = arith.constant dense<0xFF800000> : vector<1xf32>
    %51 = vector.multi_reduction <maximumf>, %50, %cst_23 [1] : vector<1x128xf32> to vector<1xf32>
    %52 = vector.shape_cast %51 : vector<1xf32> to vector<1x1xf32>
    %53 = vector.broadcast %52 : vector<1x1xf32> to vector<1x128xf32>
    %54 = arith.subf %50, %53 : vector<1x128xf32>
    %55 = math.exp %54 : vector<1x128xf32>
    %cst_24 = arith.constant dense<0.000000e+00> : vector<1xf32>
    %56 = vector.multi_reduction <add>, %55, %cst_24 [1] : vector<1x128xf32> to vector<1xf32>
    %57 = vector.shape_cast %56 : vector<1xf32> to vector<1x1xf32>
    %58 = tpu.reciprocal %57 {approx = true} : vector<1x1xf32> -> vector<1x1xf32>
    %59 = vector.broadcast %58 : vector<1x1xf32> to vector<1x128xf32>
    %60 = arith.mulf %55, %59 : vector<1x128xf32>
    %c0_25 = arith.constant 0 : index
    %c0_26 = arith.constant 0 : index
    %61 = vector.load %arg7[%c0_25, %c0_26] : memref<1x128xf32, #tpu.memory_space<vmem>>, vector<1x128xf32>
    tpu.vector_store %arg7[%c0_25, %c0_26], %60 {strides = array<i32>} : memref<1x128xf32, #tpu.memory_space<vmem>>, vector<1x128xf32>,
    return
  }
  func.func @transform_0(%arg0: i32) -> (i32, i32) {
    %c0_i32 = arith.constant 0 : i32
    %c0_i32_0 = arith.constant 0 : i32
    %c0_i32_1 = arith.constant 0 : i32
    return %c0_i32, %c0_i32_0 : i32, i32
  }
  func.func @transform_1(%arg0: i32) -> (i32, i32) {
    %c0_i32 = arith.constant 0 : i32
    %c0_i32_0 = arith.constant 0 : i32
    %c0_i32_1 = arith.constant 0 : i32
    return %c0_i32, %c0_i32_0 : i32, i32
  }
  func.func @transform_2(%arg0: i32) -> (i32, i32) {
    %c0_i32 = arith.constant 0 : i32
    %c0_i32_0 = arith.constant 0 : i32
    %c0_i32_1 = arith.constant 0 : i32
    return %c0_i32, %c0_i32_0 : i32, i32
  }
  func.func @transform_3(%arg0: i32) -> (i32, i32) {
    %c0_i32 = arith.constant 0 : i32
    %c0_i32_0 = arith.constant 0 : i32
    %c0_i32_1 = arith.constant 0 : i32
    return %c0_i32, %c0_i32_0 : i32, i32
  }
  func.func @transform_4(%arg0: i32) -> (i32, i32) {
    %c0_i32 = arith.constant 0 : i32
    %c0_i32_0 = arith.constant 0 : i32
    %c0_i32_1 = arith.constant 0 : i32
    return %c0_i32, %c0_i32_0 : i32, i32
  }
  func.func @transform_5(%arg0: i32) -> (i32, i32) {
    %c0_i32 = arith.constant 0 : i32
    %c0_i32_0 = arith.constant 0 : i32
    %c0_i32_1 = arith.constant 0 : i32
    return %c0_i32, %c0_i32_0 : i32, i32
  }
  func.func @transform_6(%arg0: i32) -> (i32, i32) {
    %c0_i32 = arith.constant 0 : i32
    %c0_i32_0 = arith.constant 0 : i32
    %c0_i32_1 = arith.constant 0 : i32
    return %c0_i32, %c0_i32_0 : i32, i32
  }
}

</mosaic_0001>

<bundles_post_ra>
// kernel: squeeze.1
= control target key start
LH: loop header
LB: loop body
LE: loop exit
PB: predicated region body
PF: predicated region fallthrough
CT: control target
= control target key end

     0   :  { %s37_s8 = smov 116   ;;  %vm7_vm0 = vcmask 31744   ;;  %s38_s9 = smov 120   ;;  %s55_s0 = inlined_call_operand.vmem [shape: f32[16], index: 0, kind: input, shape index: {}]   ;;  %s56_s1 = inlined_call_operand.vmem [shape: f32[4,4], index: 1, kind: output, shape index: {}]  }
   0x1   :  { %v4_v0 = vld [vmem:[%s55_s0] sm:$0x1]  ;;  %s36_s0 = smov 124  }
   0x2   :  { %5 = vst [vmem:[#allocation1] sm:$0x1] %v4_v0 }
   0x9   :  { %v9_v1 = vld [vmem:[#allocation1] sm:$0x1]  }
   0xa   :  { %v21_v2 = vld [vmem:[#allocation1] sm:$0x1]   ;;  %10 = vrot.lane.b32.xlu0 %v9_v1, %s36_s0 }
   0xb   :  { %22 = vrot.lane.b32.xlu1 %v21_v2, %s37_s8  ;;  %v6_v3 = vld [vmem:[#allocation1] sm:$0x1]  }
   0xc   :  { %v15_v4 = vld [vmem:[#allocation1] sm:$0x1]   ;;  %8 = vst.msk [vmem:[#allocation0] sm:$0x1] %vm7_vm0, %v6_v3  }
   0xe   :  { %16 = vrot.lane.b32.xlu0 %v15_v4, %s38_s9 }
  0x7c   :  { %v11_v5 = vpop.permute.xlu0 %10  }
  0x7d   :  { %v23_v6 = vpop.permute.xlu1 %22   ;;  %14 = vst.msk [vmem:[#allocation0 + $0x1] sm:$0x1] %vm7_vm0, %v11_v5  }
  0x7e   :  { %26 = vst.msk [vmem:[#allocation0 + $0x3] sm:$0x1] %vm7_vm0, %v23_v6  }
  0x80   :  { %v17_v7 = vpop.permute.xlu0 %16  }
  0x81   :  { %20 = vst.msk [vmem:[#allocation0 + $0x2] sm:$0x1] %vm7_vm0, %v17_v7  }
  0x88   :  { %v30_v8 = vld [vmem:[#allocation0] sm:$0xf] }
  0x89   :  { %32 = vst [vmem:[%s56_s1] sm:$0xf] %v30_v8 }

// kernel: compute_density.1
= control target key start
LH: loop header
LB: loop body
LE: loop exit
PB: predicated region body
PF: predicated region fallthrough
CT: control target
= control target key end

     0   :  { %vm1407_vm0 = vmmov 0   ;;  %s1408_s15 = smov 127   ;;  %s1409_s16 = smov 2   ;;  %vm993_vm2 = vcmask 1040384   ;;  %s1787_s1 = inlined_call_operand.vmem [shape: bf16[640,128], index: 1, kind: input, shape index: {}]   ;;  %s1788_s0 = inlined_call_operand.vmem [shape: bf16[128,640], index: 0, kind: input, shape index: {}]   ;;  %s1789_s2 = inlined_call_operand.vmem [shape: f32[1,128], index: 2, kind: input, shape index: {}]   ;;  %s1790_s3 = inlined_call_operand.vmem [shape: bf16[8,128], index: 3, kind: input, shape index: {}]   ;;  %s1791_s4 = inlined_call_operand.vmem [shape: f32[1,128], index: 4, kind: input, shape index: {}]   ;;  %s1792_s5 = inlined_call_operand.vmem [shape: f32[16,128], index: 5, kind: input, shape index: {}]   ;;  %s1793_s6 = inlined_call_operand.vmem [shape: f32[1,128], index: 6, kind: output, shape index: {}]  }
   0x1   :  { %v1306_v0 = vld [vmem:[%s1787_s1 + $0x40] sm:$0xff]   ;;  %v1310_v4 = vld [vmem:[%s1787_s1 + $0x48] sm:$0xff]   ;;  %v1314_v8 = vld [vmem:[%s1787_s1 + $0x50] sm:$0xff]   ;;  %s1410_s17 = smov 126   ;;  %s1411_s18 = smov 1  }
   0x2   :  { %v1307_v1 = vld [vmem:[%s1787_s1] sm:$0xff]   ;;  %1091 = vmatprep.subr.bf16.mxu0 %v1306_v0  ;;  %v1311_v5 = vld [vmem:[%s1787_s1 + $0x8] sm:$0xff]   ;;  %v1315_v9 = vld [vmem:[%s1787_s1 + $0x10] sm:$0xff]   ;;  %s1412_s24 = smov 4   ;;  %s1413_s25 = smov 8  }
   0x3   :  { %v1308_v2 = vld [vmem:[%s1787_s1 + $0xc0] sm:$0xff]   ;;  %1092 = vmatpush3.bf16.msra.mxu0 %v1307_v1  ;;  %v1312_v6 = vld [vmem:[%s1787_s1 + $0xc8] sm:$0xff]   ;;  %v1316_v10 = vld [vmem:[%s1787_s1 + $0xd0] sm:$0xff]   ;;  %s1414_s26 = smov 120   ;;  %s1415_s27 = smov 124  }
   0x4   :  { %v1309_v3 = vld [vmem:[%s1787_s1 + $0x80] sm:$0xff]   ;;  %1155 = vmatprep.subr.bf16.mxu1 %v1308_v2  ;;  %1093 = vmatprep.subr.bf16.mxu0 %v1310_v4  ;;  %v1313_v7 = vld [vmem:[%s1787_s1 + $0x88] sm:$0xff]   ;;  %v1317_v11 = vld [vmem:[%s1787_s1 + $0x90] sm:$0xff]  }
   0x5   :  { %1156 = vmatpush3.bf16.msra.mxu1 %v1309_v3  ;;  %v1318_v12 = vld [vmem:[%s1787_s1 + $0x58] sm:$0xff]   ;;  %v1322_v16 = vld [vmem:[%s1787_s1 + $0x60] sm:$0xff]   ;;  %v1326_v20 = vld [vmem:[%s1787_s1 + $0x68] sm:$0xff]  }
   0x6   :  { %1157 = vmatprep.subr.bf16.mxu1 %v1312_v6  ;;  %v1319_v13 = vld [vmem:[%s1787_s1 + $0x18] sm:$0xff]   ;;  %v1323_v17 = vld [vmem:[%s1787_s1 + $0x20] sm:$0xff]   ;;  %v1327_v21 = vld [vmem:[%s1787_s1 + $0x28] sm:$0xff]  }
   0x7   :  { %1094 = vmatpush3.bf16.msra.mxu0 %v1311_v5  ;;  %v1320_v14 = vld [vmem:[%s1787_s1 + $0xd8] sm:$0xff]   ;;  %v1324_v18 = vld [vmem:[%s1787_s1 + $0xe0] sm:$0xff]   ;;  %v1328_v22 = vld [vmem:[%s1787_s1 + $0xe8] sm:$0xff]  }
   0x8   :  { %1095 = vmatprep.subr.bf16.mxu0 %v1314_v8  ;;  %v1321_v15 = vld [vmem:[%s1787_s1 + $0x98] sm:$0xff]   ;;  %v1325_v19 = vld [vmem:[%s1787_s1 + $0xa0] sm:$0xff]   ;;  %v1329_v23 = vld [vmem:[%s1787_s1 + $0xa8] sm:$0xff]  }
   0x9   :  { %1158 = vmatpush3.bf16.msra.mxu1 %v1313_v7  ;;  %v1330_v24 = vld [vmem:[%s1787_s1 + $0x70] sm:$0xff]   ;;  %v1334_v28 = vld [vmem:[%s1787_s1 + $0x78] sm:$0xff]   ;;  %v1341_v34 = vld [vmem:[%s1787_s1 + $0x100] sm:$0xff]  }
   0xa   :  { %1159 = vmatprep.subr.bf16.mxu1 %v1316_v10  ;;  %v1331_v25 = vld [vmem:[%s1787_s1 + $0x30] sm:$0xff]   ;;  %v1335_v29 = vld [vmem:[%s1787_s1 + $0x38] sm:$0xff]   ;;  %v1344_v36 = vld [vmem:[%s1788_s0 + $0xc] ss:$20 sps:$4 sm:$0xff]  }
   0xb   :  { %1096 = vmatpush3.bf16.msra.mxu0 %v1315_v9  ;;  %v1332_v26 = vld [vmem:[%s1787_s1 + $0xf0] sm:$0xff]   ;;  %v1336_v30 = vld [vmem:[%s1787_s1 + $0xf8] sm:$0xff]   ;;  %v1345_v37 = vld [vmem:[%s1788_s0 + $0x2c] ss:$20 sps:$4 sm:$0xff]   ;;  %736 = vmatprep.mubr.bf16.mxu1 %v1344_v36 }
   0xc   :  { %1097 = vmatprep.subr.bf16.mxu0 %v1318_v12  ;;  %v1333_v27 = vld [vmem:[%s1787_s1 + $0xb0] sm:$0xff]   ;;  %v1339_v32 = vld [vmem:[%s1788_s0 + $0x4] ss:$20 sps:$4 sm:$0xff]   ;;  %v1342_v35 = vld [vmem:[%s1788_s0 + $0x8] ss:$20 sps:$4 sm:$0xff]  }
   0xd   :  { %1160 = vmatpush3.bf16.msra.mxu1 %v1317_v11  ;;  %v1337_v31 = vld [vmem:[%s1788_s0] ss:$20 sps:$4 sm:$0xff]   ;;  %v1340_v33 = vld [vmem:[%s1787_s1 + $0xb8] sm:$0xff]   ;;  %639 = vmatprep.mubr.bf16.mxu0 %v1339_v32  ;;  %v1348_v38 = vld [vmem:[%s1787_s1 + $0x108] sm:$0xff]  }
   0xe   :  { %1161 = vmatprep.subr.bf16.mxu1 %v1320_v14  ;;  %v1349_v39 = vld [vmem:[%s1788_s0 + $0x34] ss:$20 sps:$4 sm:$0xff]   ;;  %v1351_v43 = vld [vmem:[%s1788_s0 + $0x30] ss:$20 sps:$4 sm:$0xff]   ;;  %v1362_v45 = vld [vmem:[%s1787_s1 + $0x118] sm:$0xff]  }
   0xf   :  { %1098 = vmatpush3.bf16.msra.mxu0 %v1319_v13  ;;  %v1347_v40 = vld [vmem:[%s1788_s0 + $0x28] ss:$20 sps:$4 sm:$0xff]   ;;  %v1355_v42 = vld [vmem:[%s1787_s1 + $0x110] sm:$0xff]   ;;  %v1369_v48 = vld [vmem:[%s1787_s1 + $0x120] sm:$0xff]  }
  0x10   :  { %1099 = vmatprep.subr.bf16.mxu0 %v1322_v16  ;;  %v1352_v41 = vld [vmem:[%s1788_s0 + $0x54] ss:$20 sps:$4 sm:$0xff]   ;;  %v1356_v44 = vld [vmem:[%s1788_s0 + $0x5c] ss:$20 sps:$4 sm:$0xff]   ;;  %v1358_v49 = vld [vmem:[%s1788_s0 + $0x58] ss:$20 sps:$4 sm:$0xff]  }
  0x11   :  { %1162 = vmatpush3.bf16.msra.mxu1 %v1321_v15  ;;  %v1354_v46 = vld [vmem:[%s1788_s0 + $0x50] ss:$20 sps:$4 sm:$0xff]   ;;  %v1376_v51 = vld [vmem:[%s1787_s1 + $0x128] sm:$0xff]   ;;  %v1365_v55 = vld [vmem:[%s1788_s0 + $0x80] ss:$20 sps:$4 sm:$0xff]   ;;  %v1406_v16 = vmov 0.0  }
  0x12   :  { %1163 = vmatprep.subr.bf16.mxu1 %v1324_v18  ;;  %v1359_v47 = vld [vmem:[%s1788_s0 + $0x7c] ss:$20 sps:$4 sm:$0xff]   ;;  %v1363_v50 = vld [vmem:[%s1788_s0 + $0x84] ss:$20 sps:$4 sm:$0xff]   ;;  %v1370_v56 = vld [vmem:[%s1788_s0 + $0xac] ss:$20 sps:$4 sm:$0xff]  }
  0x13   :  { %1100 = vmatpush3.bf16.msra.mxu0 %v1323_v17  ;;  %v1361_v52 = vld [vmem:[%s1788_s0 + $0x78] ss:$20 sps:$4 sm:$0xff]   ;;  %v1383_v54 = vld [vmem:[%s1787_s1 + $0x130] sm:$0xff]   ;;  %v1372_v60 = vld [vmem:[%s1788_s0 + $0xa8] ss:$20 sps:$4 sm:$0xff]  }
  0x14   :  { %1101 = vmatprep.subr.bf16.mxu0 %v1326_v20  ;;  %v1366_v53 = vld [vmem:[%s1788_s0 + $0xa4] ss:$20 sps:$4 sm:$0xff]   ;;  %v1368_v58 = vld [vmem:[%s1788_s0 + $0xa0] ss:$20 sps:$4 sm:$0xff]   ;;  %v1375_v62 = vld [vmem:[%s1788_s0 + $0xc8] ss:$20 sps:$4 sm:$0xff]  }
  0x15   :  { %1164 = vmatpush3.bf16.msra.mxu1 %v1325_v19  ;;  %v1390_v57 = vld [vmem:[%s1787_s1 + $0x138] sm:$0xff]   ;;  %v1373_v59 = vld [vmem:[%s1788_s0 + $0xcc] ss:$20 sps:$4 sm:$0xff]   ;;  %v1377_v61 = vld [vmem:[%s1788_s0 + $0xd4] ss:$20 sps:$4 sm:$0xff]  }
  0x16   :  { %1165 = vmatprep.subr.bf16.mxu1 %v1328_v22  ;;  %v1380_v63 = vld [vmem:[%s1788_s0 + $0xf4] ss:$20 sps:$4 sm:$0xff]   ;;  %v1379_v0 = vld [vmem:[%s1788_s0 + $0xd0] ss:$20 sps:$4 sm:$0xff]   ;;  %v1386_v4 = vld [vmem:[%s1788_s0 + $0xf8] ss:$20 sps:$4 sm:$0xff]  }
  0x17   :  { %1102 = vmatpush3.bf16.msra.mxu0 %v1327_v21  ;;  %v1384_v1 = vld [vmem:[%s1788_s0 + $0xfc] ss:$20 sps:$4 sm:$0xff]   ;;  %v1391_v5 = vld [vmem:[%s1788_s0 + $0x124] ss:$20 sps:$4 sm:$0xff]   ;;  %v1393_v8 = vld [vmem:[%s1788_s0 + $0x120] ss:$20 sps:$4 sm:$0xff]  }
  0x18   :  { %1103 = vmatprep.subr.bf16.mxu0 %v1330_v24  ;;  %v1382_v2 = vld [vmem:[%s1788_s0 + $0xf0] ss:$20 sps:$4 sm:$0xff]   ;;  %v1389_v6 = vld [vmem:[%s1788_s0 + $0x118] ss:$20 sps:$4 sm:$0xff]   ;;  %v1396_v10 = vld [vmem:[%s1788_s0 + $0x60] ss:$20 sps:$4 sm:$0xff]  }
  0x19   :  { %1166 = vmatpush3.bf16.msra.mxu1 %v1329_v23  ;;  %v1387_v3 = vld [vmem:[%s1788_s0 + $0x11c] ss:$20 sps:$4 sm:$0xff]   ;;  %v1395_v9 = vld [vmem:[%s1788_s0 + $0x38] ss:$20 sps:$4 sm:$0xff]   ;;  %v1400_v14 = vld [vmem:[%s1788_s0 + $0x100] ss:$20 sps:$4 sm:$0xff]  }
  0x1a   :  { %1167 = vmatprep.subr.bf16.mxu1 %v1332_v26  ;;  %v1394_v7 = vld [vmem:[%s1788_s0 + $0x10] ss:$20 sps:$4 sm:$0xff]   ;;  %v1397_v11 = vld [vmem:[%s1788_s0 + $0x88] ss:$20 sps:$4 sm:$0xff]   ;;  %v1399_v13 = vld [vmem:[%s1788_s0 + $0xd8] ss:$20 sps:$4 sm:$0xff]  }
  0x1b   :  { %1104 = vmatpush3.bf16.msra.mxu0 %v1331_v25  ;;  %v1398_v12 = vld [vmem:[%s1788_s0 + $0xb0] ss:$20 sps:$4 sm:$0xff]   ;;  %v1401_v15 = vld [vmem:[%s1788_s0 + $0x128] ss:$20 sps:$4 sm:$0xff]   ;;  %v1695_v18 = vld [vmem:[%s1789_s2] ss:$0 sm:$0xff] }
  0x1c   :  { %1105 = vmatprep.subr.bf16.mxu0 %v1334_v28 }
  0x1d   :  { %1168 = vmatpush3.bf16.msra.mxu1 %v1333_v27 }
  0x1e   :  { %1169 = vmatprep.subr.bf16.mxu1 %v1336_v30 }
  0x1f   :  { %1106 = vmatpush3.bf16.msra.mxu0 %v1335_v29 }
  0x20   :  { %1244 = vmatprep.subr.bf16.mxu0 %v1341_v34 }
  0x21   :  { %1170 = vmatpush3.bf16.msra.mxu1 %v1340_v33 }
  0x22   :  { %640 = vmatmul.mubr.bf16.vlgmr.msra.gmra.mrb[0].mxu0 %v1337_v31  ;;  %1276 = vmatprep.subr.bf16.mxu1 %v1406_v16 }
  0x23   :  { %1245 = vmatpush3.bf16.msra.mxu0 %v1341_v34  ;;  %647 = vmatprep.mubr.bf16.mxu0 %v1345_v37 }
  0x24   :  { %737 = vmatmul.mubr.bf16.vlgmr.msra.gmra.mrb[0].mxu1 %v1342_v35  ;;  %1246 = vmatprep.subr.bf16.mxu0 %v1348_v38 }
  0x25   :  { %744 = vmatprep.mubr.bf16.mxu1 %v1349_v39 }
  0x27   :  { %1247 = vmatpush3.bf16.msra.mxu0 %v1348_v38 }
  0x28   :  { %1248 = vmatprep.subr.bf16.mxu0 %v1355_v42 }
  0x2a   :  { %648 = vmatmul.mubr.bf16.gmra.mrb[4].mxu0 %v1347_v40 }
  0x2b   :  { %655 = vmatprep.mubr.bf16.mxu0 %v1352_v41  ;;  %1249 = vmatpush3.bf16.msra.mxu0 %v1355_v42 }
  0x2c   :  { %745 = vmatmul.mubr.bf16.gmra.mrb[4].mxu1 %v1351_v43  ;;  %1250 = vmatprep.subr.bf16.mxu0 %v1362_v45 }
  0x2d   :  { %752 = vmatprep.mubr.bf16.mxu1 %v1356_v44 }
  0x2f   :  { %1251 = vmatpush3.bf16.msra.mxu0 %v1362_v45 }
  0x30   :  { %1252 = vmatprep.subr.bf16.mxu0 %v1369_v48 }
  0x32   :  { %656 = vmatmul.mubr.bf16.gmra.mrb[8].mxu0 %v1354_v46 }
  0x33   :  { %663 = vmatprep.mubr.bf16.mxu0 %v1359_v47  ;;  %1253 = vmatpush3.bf16.msra.mxu0 %v1369_v48 }
  0x34   :  { %753 = vmatmul.mubr.bf16.gmra.mrb[8].mxu1 %v1358_v49  ;;  %1254 = vmatprep.subr.bf16.mxu0 %v1376_v51 }
  0x35   :  { %760 = vmatprep.mubr.bf16.mxu1 %v1363_v50 }
  0x37   :  { %1255 = vmatpush3.bf16.msra.mxu0 %v1376_v51 }
  0x38   :  { %1256 = vmatprep.subr.bf16.mxu0 %v1383_v54 }
  0x3a   :  { %664 = vmatmul.mubr.bf16.gmra.mrb[12].mxu0 %v1361_v52 }
  0x3b   :  { %671 = vmatprep.mubr.bf16.mxu0 %v1366_v53  ;;  %1257 = vmatpush3.bf16.msra.mxu0 %v1383_v54 }
  0x3c   :  { %761 = vmatmul.mubr.bf16.gmra.mrb[12].mxu1 %v1365_v55  ;;  %1258 = vmatprep.subr.bf16.mxu0 %v1390_v57 }
  0x3d   :  { %768 = vmatprep.mubr.bf16.mxu1 %v1370_v56 }
  0x3f   :  { %1259 = vmatpush3.bf16.msra.mxu0 %v1390_v57 }
  0x42   :  { %672 = vmatmul.mubr.bf16.gmra.mrb[16].mxu0 %v1368_v58 }
  0x43   :  { %679 = vmatprep.mubr.bf16.mxu0 %v1373_v59 }
  0x44   :  { %769 = vmatmul.mubr.bf16.gmra.mrb[16].mxu1 %v1372_v60 }
  0x45   :  { %776 = vmatprep.mubr.bf16.mxu1 %v1377_v61 }
  0x4a   :  { %680 = vmatmul.mubr.bf16.gmra.mrb[20].mxu0 %v1375_v62 }
  0x4b   :  { %687 = vmatprep.mubr.bf16.mxu0 %v1380_v63 }
  0x4c   :  { %777 = vmatmul.mubr.bf16.gmra.mrb[20].mxu1 %v1379_v0 }
  0x4d   :  { %784 = vmatprep.mubr.bf16.mxu1 %v1384_v1 }
  0x52   :  { %688 = vmatmul.mubr.bf16.gmra.mrb[24].mxu0 %v1382_v2 }
  0x53   :  { %695 = vmatprep.mubr.bf16.mxu0 %v1387_v3 }
  0x54   :  { %785 = vmatmul.mubr.bf16.gmra.mrb[24].mxu1 %v1386_v4 }
  0x55   :  { %792 = vmatprep.mubr.bf16.mxu1 %v1391_v5 }
  0x5a   :  { %696 = vmatmul.mubr.bf16.gmra.mrb[28].mxu0 %v1389_v6 }
  0x5b   :  { %1260 = vmatprep.mubr.bf16.mxu0 %v1394_v7 }
  0x5c   :  { %793 = vmatmul.mubr.bf16.gmra.mrb[28].mxu1 %v1393_v8 }
  0x5d   :  { %1292 = vmatprep.mubr.msk.bf16.mxu1 %vm1407_vm0, %v1406_v16 }
  0x62   :  { %1261 = vmatmul.mubr.bf16.vlgmr.msra.gmra.mrb[32].mxu0 %v1395_v9 }
  0x63   :  { %1264 = vmatprep.mubr.bf16.mxu0 %v1396_v10 }
  0x6a   :  { %1265 = vmatmul.mubr.bf16.gmra.mrb[36].mxu0 %v1397_v11 }
  0x6b   :  { %1268 = vmatprep.mubr.bf16.mxu0 %v1398_v12 }
  0x72   :  { %1269 = vmatmul.mubr.bf16.gmra.mrb[40].mxu0 %v1399_v13 }
  0x73   :  { %1272 = vmatprep.mubr.bf16.mxu0 %v1400_v14 }
  0x7a   :  { %1273 = vmatmul.mubr.bf16.gmra.mrb[44].mxu0 %v1401_v15 }
  0xf5   :  { %v1107_v17 = vpop.f32.mrb[0].mxu0 }
  0xf6   :  { %v1108_v19 = vpop.f32.mrb[1].mxu0 }
  0xf7   :  { %v1109_v20 = vadd.f32 %v1108_v19, %v1107_v17  ;;  %v1110_v21 = vpop.f32.mrb[2].mxu0  ;;  %v1171_v22 = vpop.f32.mrb[0].mxu1 }
  0xf8   :  { %v1111_v23 = vpop.f32.mrb[3].mxu0  ;;  %v1172_v26 = vpop.f32.mrb[1].mxu1 }
  0xf9   :  { %v642_v24 = vadd.f32 %v1109_v20, %v1695_v18  ;;  %v1112_v25 = vadd.f32 %v1111_v23, %v1110_v21  ;;  %v1173_v27 = vadd.f32 %v1172_v26, %v1171_v22  ;;  %v1174_v28 = vpop.f32.mrb[2].mxu1 }
  0xfa   :  { %v1175_v30 = vpop.f32.mrb[3].mxu1 }
  0xfb   :  { %v645_v29 = vadd.f32 %v1112_v25, %v1695_v18  ;;  %v1176_v31 = vadd.f32 %v1175_v30, %v1174_v28  ;;  %v1700_v32 = vadd.f32 %v1173_v27, %v642_v24 }
  0xfd   :  { %v1113_v33 = vpop.f32.mrb[4].mxu0  ;;  %v1702_v35 = vadd.f32 %v1176_v31, %v645_v29 }
  0xfe   :  { %v1114_v34 = vpop.f32.mrb[5].mxu0 }
  0xff   :  { %v1115_v36 = vadd.f32 %v1114_v34, %v1113_v33  ;;  %v1116_v37 = vpop.f32.mrb[6].mxu0  ;;  %v1177_v38 = vpop.f32.mrb[4].mxu1 }
 0x100   :  { %v1117_v39 = vpop.f32.mrb[7].mxu0  ;;  %v1178_v42 = vpop.f32.mrb[5].mxu1 }
 0x101   :  { %v650_v40 = vadd.f32 %v1115_v36, %v1695_v18  ;;  %v1118_v41 = vadd.f32 %v1117_v39, %v1116_v37  ;;  %v1179_v43 = vadd.f32 %v1178_v42, %v1177_v38  ;;  %v1180_v44 = vpop.f32.mrb[6].mxu1 }
 0x102   :  { %v1181_v46 = vpop.f32.mrb[7].mxu1 }
 0x103   :  { %v653_v45 = vadd.f32 %v1118_v41, %v1695_v18  ;;  %v1182_v47 = vadd.f32 %v1181_v46, %v1180_v44  ;;  %v1706_v48 = vadd.f32 %v1179_v43, %v650_v40 }
 0x105   :  { %v1119_v49 = vpop.f32.mrb[8].mxu0  ;;  %v1708_v51 = vadd.f32 %v1182_v47, %v653_v45 }
 0x106   :  { %v1120_v50 = vpop.f32.mrb[9].mxu0 }
 0x107   :  { %v1121_v52 = vadd.f32 %v1120_v50, %v1119_v49  ;;  %v1122_v53 = vpop.f32.mrb[10].mxu0  ;;  %v1183_v54 = vpop.f32.mrb[8].mxu1 }
 0x108   :  { %v1123_v55 = vpop.f32.mrb[11].mxu0  ;;  %v1184_v58 = vpop.f32.mrb[9].mxu1 }
 0x109   :  { %v658_v56 = vadd.f32 %v1121_v52, %v1695_v18  ;;  %v1124_v57 = vadd.f32 %v1123_v55, %v1122_v53  ;;  %v1185_v59 = vadd.f32 %v1184_v58, %v1183_v54  ;;  %v1186_v60 = vpop.f32.mrb[10].mxu1 }
 0x10a   :  { %v1187_v62 = vpop.f32.mrb[11].mxu1 }
 0x10b   :  { %v661_v61 = vadd.f32 %v1124_v57, %v1695_v18  ;;  %v1188_v63 = vadd.f32 %v1187_v62, %v1186_v60  ;;  %v1712_v0 = vadd.f32 %v1185_v59, %v658_v56 }
 0x10d   :  { %v1125_v1 = vpop.f32.mrb[12].mxu0  ;;  %v1714_v3 = vadd.f32 %v1188_v63, %v661_v61 }
 0x10e   :  { %v1126_v2 = vpop.f32.mrb[13].mxu0 }
 0x10f   :  { %v1127_v4 = vadd.f32 %v1126_v2, %v1125_v1  ;;  %v1128_v5 = vpop.f32.mrb[14].mxu0  ;;  %v1189_v6 = vpop.f32.mrb[12].mxu1 }
 0x110   :  { %v1129_v7 = vpop.f32.mrb[15].mxu0  ;;  %v1190_v10 = vpop.f32.mrb[13].mxu1 }
 0x111   :  { %v666_v8 = vadd.f32 %v1127_v4, %v1695_v18  ;;  %v1130_v9 = vadd.f32 %v1129_v7, %v1128_v5  ;;  %v1191_v11 = vadd.f32 %v1190_v10, %v1189_v6  ;;  %v1192_v12 = vpop.f32.mrb[14].mxu1 }
 0x112   :  { %v1193_v14 = vpop.f32.mrb[15].mxu1 }
 0x113   :  { %v669_v13 = vadd.f32 %v1130_v9, %v1695_v18  ;;  %v1194_v15 = vadd.f32 %v1193_v14, %v1192_v12  ;;  %v1718_v17 = vadd.f32 %v1191_v11, %v666_v8 }
 0x115   :  { %v1131_v19 = vpop.f32.mrb[16].mxu0  ;;  %v1720_v21 = vadd.f32 %v1194_v15, %v669_v13 }
 0x116   :  { %v1132_v20 = vpop.f32.mrb[17].mxu0 }
 0x117   :  { %v1133_v22 = vadd.f32 %v1132_v20, %v1131_v19  ;;  %v1134_v23 = vpop.f32.mrb[18].mxu0  ;;  %v1195_v24 = vpop.f32.mrb[16].mxu1 }
 0x118   :  { %v1135_v25 = vpop.f32.mrb[19].mxu0  ;;  %v1196_v28 = vpop.f32.mrb[17].mxu1 }
 0x119   :  { %v674_v26 = vadd.f32 %v1133_v22, %v1695_v18  ;;  %v1136_v27 = vadd.f32 %v1135_v25, %v1134_v23  ;;  %v1197_v29 = vadd.f32 %v1196_v28, %v1195_v24  ;;  %v1198_v30 = vpop.f32.mrb[18].mxu1 }
 0x11a   :  { %v1199_v33 = vpop.f32.mrb[19].mxu1 }
 0x11b   :  { %v677_v31 = vadd.f32 %v1136_v27, %v1695_v18  ;;  %v1200_v34 = vadd.f32 %v1199_v33, %v1198_v30  ;;  %v1724_v36 = vadd.f32 %v1197_v29, %v674_v26 }
 0x11d   :  { %v1137_v37 = vpop.f32.mrb[20].mxu0  ;;  %v1726_v39 = vadd.f32 %v1200_v34, %v677_v31 }
 0x11e   :  { %v1138_v38 = vpop.f32.mrb[21].mxu0 }
 0x11f   :  { %v1139_v40 = vadd.f32 %v1138_v38, %v1137_v37  ;;  %v1140_v41 = vpop.f32.mrb[22].mxu0  ;;  %v1201_v42 = vpop.f32.mrb[20].mxu1 }
 0x120   :  { %v1141_v43 = vpop.f32.mrb[23].mxu0  ;;  %v1202_v46 = vpop.f32.mrb[21].mxu1 }
 0x121   :  { %v682_v44 = vadd.f32 %v1139_v40, %v1695_v18  ;;  %v1142_v45 = vadd.f32 %v1141_v43, %v1140_v41  ;;  %v1203_v47 = vadd.f32 %v1202_v46, %v1201_v42  ;;  %v1204_v49 = vpop.f32.mrb[22].mxu1 }
 0x122   :  { %v1205_v52 = vpop.f32.mrb[23].mxu1 }
 0x123   :  { %v685_v50 = vadd.f32 %v1142_v45, %v1695_v18  ;;  %v1206_v53 = vadd.f32 %v1205_v52, %v1204_v49  ;;  %v779_v54 = vadd.f32 %v1203_v47, %v682_v44 }
 0x125   :  { %v1143_v55 = vpop.f32.mrb[24].mxu0  ;;  %v782_v57 = vadd.f32 %v1206_v53, %v685_v50 }
 0x126   :  { %v1144_v56 = vpop.f32.mrb[25].mxu0 }
 0x127   :  { %v1145_v58 = vadd.f32 %v1144_v56, %v1143_v55  ;;  %v1146_v59 = vpop.f32.mrb[26].mxu0  ;;  %v1207_v60 = vpop.f32.mrb[24].mxu1 }
 0x128   :  { %v1147_v61 = vpop.f32.mrb[27].mxu0  ;;  %v1208_v1 = vpop.f32.mrb[25].mxu1 }
 0x129   :  { %v690_v62 = vadd.f32 %v1145_v58, %v1695_v18  ;;  %v1148_v63 = vadd.f32 %v1147_v61, %v1146_v59  ;;  %v1209_v2 = vadd.f32 %v1208_v1, %v1207_v60  ;;  %v1210_v4 = vpop.f32.mrb[26].mxu1 }
 0x12a   :  { %v1211_v6 = vpop.f32.mrb[27].mxu1 }
 0x12b   :  { %v693_v5 = vadd.f32 %v1148_v63, %v1695_v18  ;;  %v1212_v7 = vadd.f32 %v1211_v6, %v1210_v4  ;;  %v787_v8 = vadd.f32 %v1209_v2, %v690_v62 }
 0x12d   :  { %v1149_v9 = vpop.f32.mrb[28].mxu0  ;;  %v790_v11 = vadd.f32 %v1212_v7, %v693_v5 }
 0x12e   :  { %v1150_v10 = vpop.f32.mrb[29].mxu0 }
 0x12f   :  { %v1151_v12 = vadd.f32 %v1150_v10, %v1149_v9  ;;  %v1152_v13 = vpop.f32.mrb[30].mxu0  ;;  %v1213_v14 = vpop.f32.mrb[28].mxu1 }
 0x130   :  { %v1153_v15 = vpop.f32.mrb[31].mxu0  ;;  %v1214_v22 = vpop.f32.mrb[29].mxu1 }
 0x131   :  { %v698_v19 = vadd.f32 %v1151_v12, %v1695_v18  ;;  %v1154_v20 = vadd.f32 %v1153_v15, %v1152_v13  ;;  %v1215_v23 = vadd.f32 %v1214_v22, %v1213_v14  ;;  %v1216_v24 = vpop.f32.mrb[30].mxu1  ;;  %v956_v13 = vld [vmem:[%s1792_s5 + $0x1] sm:$0x1]  ;;  %v961_v14 = vld [vmem:[%s1792_s5 + $0x2] sm:$0x1] }
 0x132   :  { %v1217_v26 = vpop.f32.mrb[31].mxu1  ;;  %v966_v22 = vld [vmem:[%s1792_s5 + $0x3] sm:$0x1] }
 0x133   :  { %v701_v25 = vadd.f32 %v1154_v20, %v1695_v18  ;;  %v1218_v27 = vadd.f32 %v1217_v26, %v1216_v24  ;;  %v795_v28 = vadd.f32 %v1215_v23, %v698_v19 }
 0x135   :  { %v1262_v29 = vpop.f32.mrb[32].mxu0  ;;  %v798_v33 = vadd.f32 %v1218_v27, %v701_v25 }
 0x136   :  { %v844_v30 = vadd.f32 %v1262_v29, %v1706_v48  ;;  %v835_v31 = vpop.f32.mrb[33].mxu0  ;;  %v971_v29 = vld [vmem:[%s1792_s5 + $0x4] sm:$0x1] }
 0x137   :  { %v836_v34 = vadd.f32 %v835_v31, %v1700_v32  ;;  %v1263_v37 = vpop.f32.mrb[34].mxu0 }
 0x138   :  { %v847_v38 = vadd.f32 %v1263_v37, %v1708_v51  ;;  %v838_v40 = vpop.f32.mrb[35].mxu0  ;;  %v981_v37 = vld [vmem:[%s1792_s5 + $0x6] sm:$0x1] }
 0x139   :  { %v839_v41 = vadd.f32 %v838_v40, %v1702_v35 }
 0x13a   :  { %v900_v42 = vpack.c.bf16 %v847_v38, %v844_v30  ;;  %v976_v30 = vld [vmem:[%s1792_s5 + $0x5] sm:$0x1] }
 0x13b   :  { %v899_v43 = vpack.c.bf16 %v839_v41, %v836_v34  ;;  %v986_v41 = vld [vmem:[%s1792_s5 + $0x7] sm:$0x1] }
 0x13d   :  { %v1266_v44 = vpop.f32.mrb[36].mxu0  ;;  %1277 = vmatpush3.bf16.xpose.msra.mxu1 %v899_v43 }
 0x13e   :  { %v860_v18 = vadd.f32 %v1266_v44, %v1718_v17  ;;  %v851_v45 = vpop.f32.mrb[37].mxu0  ;;  %1278 = vmatprep.subr.bf16.mxu1 %v1406_v16 }
 0x13f   :  { %v852_v48 = vadd.f32 %v851_v45, %v1712_v0  ;;  %v1267_v46 = vpop.f32.mrb[38].mxu0 }
 0x140   :  { %v863_v32 = vadd.f32 %v1267_v46, %v1720_v21  ;;  %v854_v47 = vpop.f32.mrb[39].mxu0  ;;  %v989_v46 = vld [vmem:[%s1792_s5 + $0x8] sm:$0x1] }
 0x141   :  { %v855_v51 = vadd.f32 %v854_v47, %v1714_v3  ;;  %vm990_vm1 = vcmp.ne.f32.partialorder %v989_v46, 0.0 }
 0x142   :  { %v902_v49 = vpack.c.bf16 %v863_v32, %v860_v18 }
 0x143   :  { %v901_v50 = vpack.c.bf16 %v855_v51, %v852_v48 }
 0x145   :  { %v1270_v35 = vpop.f32.mrb[40].mxu0  ;;  %1279 = vmatpush3.bf16.xpose.msra.mxu1 %v900_v42 }
 0x146   :  { %v876_v52 = vadd.f32 %v1270_v35, %v779_v54  ;;  %v867_v53 = vpop.f32.mrb[41].mxu0  ;;  %1280 = vmatprep.subr.bf16.mxu1 %v1406_v16 }
 0x147   :  { %v868_v17 = vadd.f32 %v867_v53, %v1724_v36  ;;  %v1271_v55 = vpop.f32.mrb[42].mxu0 }
 0x148   :  { %v879_v56 = vadd.f32 %v1271_v55, %v782_v57  ;;  %v870_v58 = vpop.f32.mrb[43].mxu0  ;;  %v947_v57 = vld [vmem:[%s1791_s4] sm:$0x1] }
 0x149   :  { %v871_v0 = vadd.f32 %v870_v58, %v1726_v39  ;;  %v898_v39 = vld [vmem:[%s1790_s3] sm:$0xf] }
 0x14a   :  { %v904_v59 = vpack.c.bf16 %v879_v56, %v876_v52 }
 0x14b   :  { %v903_v21 = vpack.c.bf16 %v871_v0, %v868_v17 }
 0x14d   :  { %v1274_v60 = vpop.f32.mrb[44].mxu0  ;;  %1281 = vmatpush3.bf16.xpose.msra.mxu1 %v901_v50 }
 0x14e   :  { %v892_v3 = vadd.f32 %v1274_v60, %v795_v28  ;;  %v883_v61 = vpop.f32.mrb[45].mxu0  ;;  %1282 = vmatprep.subr.bf16.mxu1 %v1406_v16 }
 0x14f   :  { %v884_v62 = vadd.f32 %v883_v61, %v787_v8  ;;  %v1275_v54 = vpop.f32.mrb[46].mxu0 }
 0x150   :  { %v895_v63 = vadd.f32 %v1275_v54, %v798_v33  ;;  %v886_v1 = vpop.f32.mrb[47].mxu0 }
 0x151   :  { %v887_v2 = vadd.f32 %v886_v1, %v790_v11 }
 0x152   :  { %v906_v4 = vpack.c.bf16 %v895_v63, %v892_v3 }
 0x153   :  { %v905_v36 = vpack.c.bf16 %v887_v2, %v884_v62 }
 0x155   :  { %1283 = vmatpush3.bf16.xpose.msra.mxu1 %v902_v49 }
 0x156   :  { %1284 = vmatprep.subr.bf16.mxu1 %v1406_v16 }
 0x15d   :  { %1285 = vmatpush3.bf16.xpose.msra.mxu1 %v903_v21 }
 0x15e   :  { %1286 = vmatprep.subr.bf16.mxu1 %v1406_v16 }
 0x165   :  { %1287 = vmatpush3.bf16.xpose.msra.mxu1 %v904_v59 }
 0x166   :  { %1288 = vmatprep.subr.bf16.mxu1 %v1406_v16 }
 0x16d   :  { %1289 = vmatpush3.bf16.xpose.msra.mxu1 %v905_v36 }
 0x16e   :  { %1290 = vmatprep.subr.bf16.mxu1 %v1406_v16  ;;  %v951_v16 = vld [vmem:[%s1792_s5] sm:$0x1] }
 0x175   :  { %1291 = vmatpush3.bf16.xpose.msra.mxu1 %v906_v4 }
 0x17c   :  { %1293 = vmatmul.mubr.bf16.vlgmr.msra.gmra.mrb[32].mxu1 %v898_v39 }
 0x24f   :  { %v941_v5 = vpop.f32.mrb[32].mxu1 }
 0x250   :  { %v948_v6 = vadd.f32 %v947_v57, %v941_v5  ;;  %v1294_v7 = vpop.f32.mrb[33].mxu1 }
 0x251   :  { %v944_v8 = vpop.f32.mrb[34].mxu1 }
 0x252   :  { %959 = vrot.lane.b32.xlu1 %v948_v6, %s1408_s15  ;;  %949 = vrot.lane.b32.xlu0 %v948_v6, %s1409_s16  ;;  %v1295_v9 = vpop.f32.mrb[35].mxu1 }
 0x256   :  { %964 = vrot.lane.b32.xlu1 %v948_v6, %s1410_s17  ;;  %954 = vrot.lane.b32.xlu0 %v948_v6, %s1411_s18 }
 0x2c4   :  { %v960_v10 = vpop.permute.xlu1 %959  ;;  %v950_v11 = vpop.permute.xlu0 %949 }
 0x2c5   :  { %v952_v12 = vmul.f32 %v951_v16, %v950_v11  ;;  %v962_v24 = vmul.f32 %v961_v14, %v960_v10 }
 0x2c7   :  { %v953_v19 = vadd.f32 %v952_v12, %v948_v6 }
 0x2c8   :  { %v955_v15 = vpop.permute.xlu0 %954  ;;  %v965_v23 = vpop.permute.xlu1 %964 }
 0x2c9   :  { %v957_v20 = vmul.f32 %v956_v13, %v955_v15  ;;  %v967_v26 = vmul.f32 %v966_v22, %v965_v23 }
 0x2cb   :  { %v958_v25 = vadd.f32 %v957_v20, %v953_v19 }
 0x2cd   :  { %v963_v27 = vadd.f32 %v962_v24, %v958_v25 }
 0x2cf   :  { %v968_v28 = vadd.f32 %v967_v26, %v963_v27 }
 0x2d1   :  { %974 = vrot.lane.b32.xlu1 %v968_v28, %s1412_s24  ;;  %969 = vrot.lane.b32.xlu0 %v968_v28, %s1413_s25 }
 0x2d5   :  { %984 = vrot.lane.b32.xlu1 %v968_v28, %s1414_s26  ;;  %979 = vrot.lane.b32.xlu0 %v968_v28, %s1415_s27 }
 0x343   :  { %v975_v31 = vpop.permute.xlu1 %974  ;;  %v970_v33 = vpop.permute.xlu0 %969 }
 0x344   :  { %v972_v34 = vmul.f32 %v971_v29, %v970_v33  ;;  %v977_v38 = vmul.f32 %v976_v30, %v975_v31 }
 0x346   :  { %v973_v40 = vadd.f32 %v972_v34, %v968_v28 }
 0x347   :  { %v985_v42 = vpop.permute.xlu1 %984  ;;  %v980_v43 = vpop.permute.xlu0 %979 }
 0x348   :  { %v978_v44 = vadd.f32 %v977_v38, %v973_v40  ;;  %v982_v18 = vmul.f32 %v981_v37, %v980_v43  ;;  %v987_v45 = vmul.f32 %v986_v41, %v985_v42 }
 0x34a   :  { %v983_v48 = vadd.f32 %v982_v18, %v978_v44 }
 0x34c   :  { %v988_v32 = vadd.f32 %v987_v45, %v983_v48 }
 0x34e   :  { %v991_v47 = vmul.f32 0.1, %v988_v32 }
 0x350   :  { %v992_v51 = vsel %vm990_vm1, %v991_v47, -1e+30 }
 0x351   :  { %v994_v49 = vsel %vm993_vm2, %v992_v51, -inf }
 0x352   :  { %995 = vmax.xlane.f32.xlu0 %v994_v49 }
 0x3df   :  { %v996_v50 = vpop.xlane.xlu0 %995 }
 0x3e0   :  { %v997_v35 = vsub.f32 %v992_v51, %v996_v50 }
 0x3e2   :  { %v998_v52 = vmul.f32 1.442695, %v997_v35 }
 0x3e4   :  { %1402 = vpow2.f32 %v998_v52 }
 0x3ee   :  { %v1403_v53 = vpop.eup %1402 }
 0x3ef   :  { %v1000_v17 = vsel %vm993_vm2, %v1403_v53, 0.0 }
 0x3f0   :  { %1001 = vadd.xlane.f32.xlu1 %v1000_v17 }
 0x47d   :  { %v1002_v55 = vpop.xlane.xlu1 %1001 }
 0x47e   :  { %1404 = vrcp.f32 %v1002_v55 }
 0x488   :  { %v1405_v56 = vpop.eup %1404 }
 0x489   :  { %v1004_v58 = vmul.f32 %v1405_v56, %v1403_v53 }
 0x48b   :  { %1005 = vst [vmem:[%s1793_s6] sm:$0x1] %v1004_v58 }

</bundles_post_ra>
